<compile_context>
chip_gen: v7x
topology: tpu7x:2x2x1
jax: 0.10.0
libtpu: 0.0.40
codegen_flags: <defaults>
</compile_context>

<pallas_src>
import functools
import math

import jax
import jax.numpy as jnp
from jax import lax
from jax.experimental import pallas as pl
from jax.experimental.pallas import tpu as pltpu

BN_EPS = 1e-5


# ----------------------------------------------------------------------------
# Helpers (identical math to the PyTorch reference)
# ----------------------------------------------------------------------------
def _make_divisible(v, divisor, min_value=None):
    if min_value is None:
        min_value = divisor
    new_v = max(min_value, int(v + divisor / 2) // divisor * divisor)
    if new_v < 0.9 * v:
        new_v += divisor
    return new_v


def _round_up(x, m):
    return ((x + m - 1) // m) * m


def _act(y, kind):
    if kind == "relu":
        return jnp.maximum(y, 0.0)
    if kind == "hswish":
        return y * (jnp.clip(y + 3.0, 0.0, 6.0) * (1.0 / 6.0))
    return y


def _full_spec(arr):
    nd = arr.ndim
    return pl.BlockSpec(arr.shape, lambda n, _nd=nd: (0,) * _nd)


# ----------------------------------------------------------------------------
# Fused InvertedResidual kernel (one grid step == one image)
# ----------------------------------------------------------------------------
def _ir_kernel(*refs, k, s, pad, H, W, Ho, Wo, Wo8, Hs, Ws8, act,
               use_se, has_expand, identity):
    it = iter(refs)
    x_ref = next(it)
    if has_expand:
        we_ref = next(it)
        eb_ref = next(it)
    wdw_ref = next(it)
    db_ref = next(it)
    if use_se:
        w1_ref = next(it)
        b1_ref = next(it)
        w2_ref = next(it)
        b2_ref = next(it)
    wp_ref = next(it)
    pb_ref = next(it)
    o_ref = next(it)

    # (P*Hs, Ws8, Cin) bf16 : stride-phased, zero-padded input image
    x = x_ref[0]
    rows = x.shape[0]
    dmax = (k - 1) // s

    # ---- 1x1 expand conv (bf16 MXU, f32 accumulate) + bias + act ------------
    if has_expand:
        xm = x.reshape(rows * Ws8, x.shape[2])           # Ws8 % 8 == 0 -> aligned fold
        e = jnp.dot(xm, we_ref[...], preferred_element_type=jnp.float32)
        e = _act(e + eb_ref[...], act)
        e = e.reshape(rows, Ws8, e.shape[-1])
        # Re-zero the conv-padding / alignment border (act(bias) != 0 there).
        # Mask is generated in-kernel from iotas: no lane-padded mask operand.
        r = lax.broadcasted_iota(jnp.int32, (rows, Ws8), 0)
        c = lax.broadcasted_iota(jnp.int32, (rows, Ws8), 1)
        if s == 1:
            orow, ocol = r, c
        else:
            q = r // Hs
            a = r - q * Hs
            ph = q // s
            pw = q - ph * s
            orow = s * a + ph
            ocol = s * c + pw
        valid = ((orow >= pad) & (orow < pad + H)
                 & (ocol >= pad) & (ocol < pad + W))
        e = e * valid.astype(e.dtype)[:, :, None]
    else:
        e = x.astype(jnp.float32)
    chid = e.shape[-1]

    # ---- depthwise k x k conv (stride folded into the phase layout) ---------
    # Only (dmax+1) <= k width-shifted copies of `e` are materialized; each
    # (kh, kw) tap is a leading-axis (row) slice of one of them, which is free.
    wdw = wdw_ref[...]                                   # (k*k, chid), BN scale folded
    acc = None
    for dw in range(dmax + 1):
        if dw == 0:
            e_dw = e[:, :Wo8, :]                         # aligned slice
        else:
            e_dw = e[:, dw:dw + Wo8, :]                  # one shift copy per dw
        for kh in range(k):
            dh = kh // s
            for kw in range(k):
                if kw // s != dw:
                    continue
                q = (kh % s) * s + (kw % s)              # phase index
                tap = e_dw[q * Hs + dh:q * Hs + dh + Ho, :, :]
                term = tap * wdw[kh * k + kw:kh * k + kw + 1, :]
                acc = term if acc is None else acc + term
    y = acc + db_ref[...]

    if not has_expand:
        y = _act(y, act)                                 # act precedes SE here

    # ---- SE: global pool -> FC -> ReLU -> FC -> h_sigmoid -> channel gate ---
    if use_se:
        rowsum = jnp.sum(y, axis=0)                      # (Wo8, chid)
        pooled = jnp.sum(rowsum[:Wo, :], axis=0, keepdims=True) * (1.0 / (Ho * Wo))
        h1 = jnp.dot(pooled, w1_ref[...], preferred_element_type=jnp.float32)
        h1 = jnp.maximum(h1 + b1_ref[...], 0.0)
        g = jnp.dot(h1, w2_ref[...], preferred_element_type=jnp.float32) + b2_ref[...]
        g = jnp.clip(g + 3.0, 0.0, 6.0) * (1.0 / 6.0)    # h_sigmoid
        y = y * g

    if has_expand:
        y = _act(y, act)                                 # act follows SE here

    # ---- 1x1 projection conv + bias (+ fused residual), bf16 store ----------
    out = jnp.dot(y.reshape(Ho * Wo8, chid).astype(jnp.bfloat16), wp_ref[...],
                  preferred_element_type=jnp.float32)
    out = (out + pb_ref[...]).reshape(Ho, Wo8, out.shape[-1])[:, :Wo, :]
    if identity:
        res = x[pad:pad + Ho].astype(jnp.float32)[:, pad:pad + Wo, :]
        out = out + res
    o_ref[0] = out.astype(o_ref.dtype)


def inverted_residual_forward(p, x):
    """x: (N, H, W, Cin) NHWC (any float dtype) -> (N, Ho, Wo, Cout) bfloat16."""
    N, H, W, Cin = x.shape
    assert Cin == p["inp"]
    k, s = p["k"], p["s"]
    pad = (k - 1) // 2
    Ho = (H + 2 * pad - k) // s + 1
    Wo = (W + 2 * pad - k) // s + 1
    Hp, Wp = H + 2 * pad, W + 2 * pad
    P = s * s
    Hs = -(-Hp // s)                       # rows per stride phase
    dmax = (k - 1) // s                    # max in-phase tap offset
    Wo8 = _round_up(Wo, 8)                 # sublane-aligned output width
    Ws8 = _round_up(max(-(-Wp // s), dmax + Wo8), 8)
    Cout = p["oup"]

    # bf16 feature-map HBM traffic; conv zero-padding + alignment padding, then
    # stride-phase decomposition:
    #   xph[n, (ph*s+pw)*Hs + a, b, :] == xpad[n, s*a + ph, s*b + pw, :]
    # TODO(synk): the per-block pad/phase-concat is an extra HBM round trip;
    # fusing it into the kernel via Element-offset index maps is a later pass.
    xp = jnp.pad(x.astype(jnp.bfloat16),
                 ((0, 0), (pad, Hs * s - H - pad), (pad, Ws8 * s - W - pad), (0, 0)))
    if s == 1:
        xph = xp
    else:
        xph = jnp.concatenate(
            [xp[:, ph::s, pw::s, :] for ph in range(s) for pw in range(s)], axis=1)

    operands = [xph]
    in_specs = [pl.BlockSpec((1, P * Hs, Ws8, Cin), lambda n: (n, 0, 0, 0))]

    if p["has_expand"]:
        operands += [p["we"], p["e_bias"]]
        in_specs += [_full_spec(p["we"]), _full_spec(p["e_bias"])]

    operands += [p["wdw"], p["d_bias"]]
    in_specs += [_full_spec(p["wdw"]), _full_spec(p["d_bias"])]

    if p["use_se"]:
        operands += [p["w1"], p["b1"], p["w2"], p["b2"]]
        in_specs += [_full_spec(p["w1"]), _full_spec(p["b1"]),
                     _full_spec(p["w2"]), _full_spec(p["b2"])]

    operands += [p["wp"], p["p_bias"]]
    in_specs += [_full_spec(p["wp"]), _full_spec(p["p_bias"])]

    kernel = functools.partial(
        _ir_kernel, k=k, s=s, pad=pad, H=H, W=W, Ho=Ho, Wo=Wo, Wo8=Wo8,
        Hs=Hs, Ws8=Ws8, act="hswish" if p["use_hs"] else "relu",
        use_se=p["use_se"], has_expand=p["has_expand"], identity=p["identity"])

    # TODO(synk): at real MobileNet spatial sizes add an Ho row-tile grid axis
    # for non-SE blocks (deeper pipelining, tighter VMEM bound on v7x); SE needs
    # the full-image pool and the test feature maps are tiny, so whole-image
    # blocks are kept here.
    return pl.pallas_call(
        kernel,
        out_shape=jax.ShapeDtypeStruct((N, Ho, Wo, Cout), jnp.bfloat16),
        grid=(N,),
        in_specs=in_specs,
        out_specs=pl.BlockSpec((1, Ho, Wo, Cout), lambda n: (n, 0, 0, 0)),
        compiler_params=pltpu.CompilerParams(
            dimension_semantics=("parallel",),
            vmem_limit_bytes=48 * 1024 * 1024),
    )(*operands)


# ----------------------------------------------------------------------------
# Deterministic parameter construction (eval-mode BatchNorm folded into weights)
# ----------------------------------------------------------------------------
class _KeyGen:
    def __init__(self, seed):
        self._key = jax.random.PRNGKey(seed)

    def __call__(self):
        self._key, k = jax.random.split(self._key)
        return k


def _bn_fold(c):
    # TODO(synk): BatchNorm train-mode batch statistics are data-dependent;
    # eval-mode running stats (mean=0, var=1, gamma=1, beta=0) are folded here.
    gamma = jnp.ones((c,), jnp.float32)
    beta = jnp.zeros((c,), jnp.float32)
    mean = jnp.zeros((c,), jnp.float32)
    var = jnp.ones((c,), jnp.float32)
    scale = gamma / jnp.sqrt(var + BN_EPS)
    bias = beta - mean * scale
    return scale, bias


def _conv_w(kg, cout, cin, k):
    n = k * k * cout
    return jax.random.normal(kg(), (cout, cin, k, k), jnp.float32) * math.sqrt(2.0 / n)


def build_inverted_residual_params(kg, inp, hidden_dim, oup, k, s, use_se, use_hs):
    assert s in (1, 2)
    p = dict(inp=inp, hidden=hidden_dim, oup=oup, k=k, s=s,
             use_se=bool(use_se), use_hs=bool(use_hs),
             identity=(s == 1 and inp == oup),
             has_expand=(inp != hidden_dim))
    if p["has_expand"]:
        w = _conv_w(kg, hidden_dim, inp, 1)[:, :, 0, 0]          # (hid, inp)
        es, eb = _bn_fold(hidden_dim)
        p["we"] = (jnp.transpose(w) * es[None, :]).astype(jnp.bfloat16)  # (inp, hid)
        p["e_bias"] = eb.reshape(1, hidden_dim)
    wdw = _conv_w(kg, hidden_dim, 1, k)[:, 0]                    # (hid, k, k)
    ds, db = _bn_fold(hidden_dim)
    p["wdw"] = (jnp.transpose(wdw, (1, 2, 0)).reshape(k * k, hidden_dim)
                * ds[None, :]).astype(jnp.float32)
    p["d_bias"] = db.reshape(1, hidden_dim)
    if p["use_se"]:
        cr = _make_divisible(hidden_dim // 4, 8)
        w1 = jax.random.normal(kg(), (cr, hidden_dim), jnp.float32) * 0.1
        b1 = jax.random.normal(kg(), (cr,), jnp.float32) * 0.1
        w2 = jax.random.normal(kg(), (hidden_dim, cr), jnp.float32) * 0.1
        b2 = jax.random.normal(kg(), (hidden_dim,), jnp.float32) * 0.1
        p["w1"], p["b1"] = jnp.transpose(w1), b1.reshape(1, cr)
        p["w2"], p["b2"] = jnp.transpose(w2), b2.reshape(1, hidden_dim)
    w = _conv_w(kg, oup, hidden_dim, 1)[:, :, 0, 0]              # (oup, hid)
    ps, pb = _bn_fold(oup)
    p["wp"] = (jnp.transpose(w) * ps[None, :]).astype(jnp.bfloat16)      # (hid, oup)
    p["p_bias"] = pb.reshape(1, oup)
    return p


# ----------------------------------------------------------------------------
if __name__ == "__main__":
    kg = _KeyGen(0)
    # Cover both branches: (inp==hidden vs expand), stride 1/2, SE on/off,
    # ReLU vs h_swish, and the identity (residual) path.
    blocks = [
        build_inverted_residual_params(kg, 16, 16, 16, 3, 2, True, False),
        build_inverted_residual_params(kg, 16, 64, 16, 3, 1, False, True),
        build_inverted_residual_params(kg, 16, 96, 24, 5, 2, True, True),
        build_inverted_residual_params(kg, 24, 24, 24, 3, 1, True, False),
    ]

    x = jax.random.normal(jax.random.PRNGKey(0), (2, 16, 16, 16), jnp.float32)  # NCHW
    y = jnp.transpose(x, (0, 2, 3, 1))                                          # -> NHWC
    for p in blocks:
        y = inverted_residual_forward(p, y)                                     # bf16 between blocks
    out = jnp.transpose(y, (0, 3, 1, 2)).astype(jnp.float32)                    # -> NCHW
    out = jax.block_until_ready(out)

    assert out.shape == (2, 24, 4, 4), out.shape
    assert bool(jnp.all(jnp.isfinite(out)))
    print("KERNEL_OK")
</pallas_src>

<mosaic_0001>
module attributes {stable_mosaic.version = 11 : i64} {
  func.func @_ir_kernel(%arg0: i32, %arg1: memref<1x36x16x16xbf16, #tpu.memory_space<vmem>>, %arg2: memref<9x16xf32, #tpu.memory_space<vmem>>, %arg3: memref<1x16xf32, #tpu.memory_space<vmem>>, %arg4: memref<16x8xf32, #tpu.memory_space<vmem>>, %arg5: memref<1x8xf32, #tpu.memory_space<vmem>>, %arg6: memref<8x16xf32, #tpu.memory_space<vmem>>, %arg7: memref<1x16xf32, #tpu.memory_space<vmem>>, %arg8: memref<16x16xbf16, #tpu.memory_space<vmem>>, %arg9: memref<1x16xf32, #tpu.memory_space<vmem>>, %arg10: memref<1x8x8x16xbf16, #tpu.memory_space<vmem>>) attributes {dimension_semantics = [#tpu.dimension_semantics<parallel>], iteration_bounds = array<i64: 2>, scalar_prefetch = 0 : i64, scratch_operands = 0 : i64, tpu.core_type = #tpu.core_type<tc>, window_params = [{transform_indices = @transform_0, window_bounds = array<i64: 1, 36, 16, 16>}, {pipeline_mode = #tpu.pipeline_mode<synchronous>, transform_indices = @transform_1, window_bounds = array<i64: 9, 16>}, {pipeline_mode = #tpu.pipeline_mode<synchronous>, transform_indices = @transform_2, window_bounds = array<i64: 1, 16>}, {pipeline_mode = #tpu.pipeline_mode<synchronous>, transform_indices = @transform_3, window_bounds = array<i64: 16, 8>}, {pipeline_mode = #tpu.pipeline_mode<synchronous>, transform_indices = @transform_4, window_bounds = array<i64: 1, 8>}, {pipeline_mode = #tpu.pipeline_mode<synchronous>, transform_indices = @transform_5, window_bounds = array<i64: 8, 16>}, {pipeline_mode = #tpu.pipeline_mode<synchronous>, transform_indices = @transform_6, window_bounds = array<i64: 1, 16>}, {pipeline_mode = #tpu.pipeline_mode<synchronous>, transform_indices = @transform_7, window_bounds = array<i64: 16, 16>}, {pipeline_mode = #tpu.pipeline_mode<synchronous>, transform_indices = @transform_8, window_bounds = array<i64: 1, 16>}, {transform_indices = @transform_9, window_bounds = array<i64: 1, 8, 8, 16>}]} {
    %c0 = arith.constant 0 : index
    %c0_0 = arith.constant 0 : index
    %c0_1 = arith.constant 0 : index
    %c0_2 = arith.constant 0 : index
    %0 = vector.load %arg1[%c0, %c0_0, %c0_1, %c0_2] : memref<1x36x16x16xbf16, #tpu.memory_space<vmem>>, vector<1x36x16x16xbf16>
    %1 = vector.shape_cast %0 : vector<1x36x16x16xbf16> to vector<36x16x16xbf16>
    %2 = arith.extf %1 : vector<36x16x16xbf16> to vector<36x16x16xf32>
    %c0_3 = arith.constant 0 : index
    %c0_4 = arith.constant 0 : index
    %3 = vector.load %arg2[%c0_3, %c0_4] : memref<9x16xf32, #tpu.memory_space<vmem>>, vector<9x16xf32>
    %4 = vector.extract_strided_slice %2 {offsets = [0, 0, 0], sizes = [36, 8, 16], strides = [1, 1, 1]} : vector<36x16x16xf32> to vector<36x8x16xf32>
    %5 = vector.extract_strided_slice %4 {offsets = [0, 0, 0], sizes = [8, 8, 16], strides = [1, 1, 1]} : vector<36x8x16xf32> to vector<8x8x16xf32>
    %6 = vector.extract_strided_slice %3 {offsets = [0, 0], sizes = [1, 16], strides = [1, 1]} : vector<9x16xf32> to vector<1x16xf32>
    %7 = vector.shape_cast %6 : vector<1x16xf32> to vector<1x1x16xf32>
    %8 = vector.broadcast %7 : vector<1x1x16xf32> to vector<8x8x16xf32>
    %9 = arith.mulf %5, %8 : vector<8x8x16xf32>
    %10 = vector.extract_strided_slice %4 {offsets = [9, 0, 0], sizes = [8, 8, 16], strides = [1, 1, 1]} : vector<36x8x16xf32> to vector<8x8x16xf32>
    %11 = vector.extract_strided_slice %3 {offsets = [1, 0], sizes = [1, 16], strides = [1, 1]} : vector<9x16xf32> to vector<1x16xf32>
    %12 = vector.shape_cast %11 : vector<1x16xf32> to vector<1x1x16xf32>
    %13 = vector.broadcast %12 : vector<1x1x16xf32> to vector<8x8x16xf32>
    %14 = arith.mulf %10, %13 : vector<8x8x16xf32>
    %15 = arith.addf %9, %14 : vector<8x8x16xf32>
    %16 = vector.extract_strided_slice %4 {offsets = [18, 0, 0], sizes = [8, 8, 16], strides = [1, 1, 1]} : vector<36x8x16xf32> to vector<8x8x16xf32>
    %17 = vector.extract_strided_slice %3 {offsets = [3, 0], sizes = [1, 16], strides = [1, 1]} : vector<9x16xf32> to vector<1x16xf32>
    %18 = vector.shape_cast %17 : vector<1x16xf32> to vector<1x1x16xf32>
    %19 = vector.broadcast %18 : vector<1x1x16xf32> to vector<8x8x16xf32>
    %20 = arith.mulf %16, %19 : vector<8x8x16xf32>
    %21 = arith.addf %15, %20 : vector<8x8x16xf32>
    %22 = vector.extract_strided_slice %4 {offsets = [27, 0, 0], sizes = [8, 8, 16], strides = [1, 1, 1]} : vector<36x8x16xf32> to vector<8x8x16xf32>
    %23 = vector.extract_strided_slice %3 {offsets = [4, 0], sizes = [1, 16], strides = [1, 1]} : vector<9x16xf32> to vector<1x16xf32>
    %24 = vector.shape_cast %23 : vector<1x16xf32> to vector<1x1x16xf32>
    %25 = vector.broadcast %24 : vector<1x1x16xf32> to vector<8x8x16xf32>
    %26 = arith.mulf %22, %25 : vector<8x8x16xf32>
    %27 = arith.addf %21, %26 : vector<8x8x16xf32>
    %28 = vector.extract_strided_slice %4 {offsets = [1, 0, 0], sizes = [8, 8, 16], strides = [1, 1, 1]} : vector<36x8x16xf32> to vector<8x8x16xf32>
    %29 = vector.extract_strided_slice %3 {offsets = [6, 0], sizes = [1, 16], strides = [1, 1]} : vector<9x16xf32> to vector<1x16xf32>
    %30 = vector.shape_cast %29 : vector<1x16xf32> to vector<1x1x16xf32>
    %31 = vector.broadcast %30 : vector<1x1x16xf32> to vector<8x8x16xf32>
    %32 = arith.mulf %28, %31 : vector<8x8x16xf32>
    %33 = arith.addf %27, %32 : vector<8x8x16xf32>
    %34 = vector.extract_strided_slice %4 {offsets = [10, 0, 0], sizes = [8, 8, 16], strides = [1, 1, 1]} : vector<36x8x16xf32> to vector<8x8x16xf32>
    %35 = vector.extract_strided_slice %3 {offsets = [7, 0], sizes = [1, 16], strides = [1, 1]} : vector<9x16xf32> to vector<1x16xf32>
    %36 = vector.shape_cast %35 : vector<1x16xf32> to vector<1x1x16xf32>
    %37 = vector.broadcast %36 : vector<1x1x16xf32> to vector<8x8x16xf32>
    %38 = arith.mulf %34, %37 : vector<8x8x16xf32>
    %39 = arith.addf %33, %38 : vector<8x8x16xf32>
    %40 = vector.extract_strided_slice %2 {offsets = [0, 1, 0], sizes = [36, 8, 16], strides = [1, 1, 1]} : vector<36x16x16xf32> to vector<36x8x16xf32>
    %41 = vector.extract_strided_slice %40 {offsets = [0, 0, 0], sizes = [8, 8, 16], strides = [1, 1, 1]} : vector<36x8x16xf32> to vector<8x8x16xf32>
    %42 = vector.extract_strided_slice %3 {offsets = [2, 0], sizes = [1, 16], strides = [1, 1]} : vector<9x16xf32> to vector<1x16xf32>
    %43 = vector.shape_cast %42 : vector<1x16xf32> to vector<1x1x16xf32>
    %44 = vector.broadcast %43 : vector<1x1x16xf32> to vector<8x8x16xf32>
    %45 = arith.mulf %41, %44 : vector<8x8x16xf32>
    %46 = arith.addf %39, %45 : vector<8x8x16xf32>
    %47 = vector.extract_strided_slice %40 {offsets = [18, 0, 0], sizes = [8, 8, 16], strides = [1, 1, 1]} : vector<36x8x16xf32> to vector<8x8x16xf32>
    %48 = vector.extract_strided_slice %3 {offsets = [5, 0], sizes = [1, 16], strides = [1, 1]} : vector<9x16xf32> to vector<1x16xf32>
    %49 = vector.shape_cast %48 : vector<1x16xf32> to vector<1x1x16xf32>
    %50 = vector.broadcast %49 : vector<1x1x16xf32> to vector<8x8x16xf32>
    %51 = arith.mulf %47, %50 : vector<8x8x16xf32>
    %52 = arith.addf %46, %51 : vector<8x8x16xf32>
    %53 = vector.extract_strided_slice %40 {offsets = [1, 0, 0], sizes = [8, 8, 16], strides = [1, 1, 1]} : vector<36x8x16xf32> to vector<8x8x16xf32>
    %54 = vector.extract_strided_slice %3 {offsets = [8, 0], sizes = [1, 16], strides = [1, 1]} : vector<9x16xf32> to vector<1x16xf32>
    %55 = vector.shape_cast %54 : vector<1x16xf32> to vector<1x1x16xf32>
    %56 = vector.broadcast %55 : vector<1x1x16xf32> to vector<8x8x16xf32>
    %57 = arith.mulf %53, %56 : vector<8x8x16xf32>
    %58 = arith.addf %52, %57 : vector<8x8x16xf32>
    %c0_5 = arith.constant 0 : index
    %c0_6 = arith.constant 0 : index
    %59 = vector.load %arg3[%c0_5, %c0_6] : memref<1x16xf32, #tpu.memory_space<vmem>>, vector<1x16xf32>
    %60 = vector.shape_cast %59 : vector<1x16xf32> to vector<1x1x16xf32>
    %61 = vector.broadcast %60 : vector<1x1x16xf32> to vector<8x8x16xf32>
    %62 = arith.addf %58, %61 : vector<8x8x16xf32>
    %cst = arith.constant 0.000000e+00 : f32
    %63 = vector.broadcast %cst : f32 to vector<8x8x16xf32>
    %64 = arith.maximumf %62, %63 : vector<8x8x16xf32>
    %cst_7 = arith.constant dense<0.000000e+00> : vector<8x16xf32>
    %65 = vector.multi_reduction <add>, %64, %cst_7 [0] : vector<8x8x16xf32> to vector<8x16xf32>
    %cst_8 = arith.constant dense<0.000000e+00> : vector<16xf32>
    %66 = vector.multi_reduction <add>, %65, %cst_8 [0] : vector<8x16xf32> to vector<16xf32>
    %67 = vector.shape_cast %66 : vector<16xf32> to vector<1x16xf32>
    %cst_9 = arith.constant 1.562500e-02 : f32
    %68 = vector.broadcast %cst_9 : f32 to vector<1x16xf32>
    %69 = arith.mulf %67, %68 : vector<1x16xf32>
    %c0_10 = arith.constant 0 : index
    %c0_11 = arith.constant 0 : index
    %70 = vector.load %arg4[%c0_10, %c0_11] : memref<16x8xf32, #tpu.memory_space<vmem>>, vector<16x8xf32>
    %cst_12 = arith.constant dense<0.000000e+00> : vector<1x8xf32>
    %71 = tpu.matmul %69, %70, %cst_12 {dimension_numbers = #tpu.dot_dimension_numbers<[1], [0], [0], [1], [0, 0, 1, 1], [], []>} : vector<1x16xf32>, vector<16x8xf32>, vector<1x8xf32> -> vector<1x8xf32>
    %c0_13 = arith.constant 0 : index
    %c0_14 = arith.constant 0 : index
    %72 = vector.load %arg5[%c0_13, %c0_14] : memref<1x8xf32, #tpu.memory_space<vmem>>, vector<1x8xf32>
    %73 = arith.addf %71, %72 : vector<1x8xf32>
    %cst_15 = arith.constant 0.000000e+00 : f32
    %74 = vector.broadcast %cst_15 : f32 to vector<1x8xf32>
    %75 = arith.maximumf %73, %74 : vector<1x8xf32>
    %c0_16 = arith.constant 0 : index
    %c0_17 = arith.constant 0 : index
    %76 = vector.load %arg6[%c0_16, %c0_17] : memref<8x16xf32, #tpu.memory_space<vmem>>, vector<8x16xf32>
    %cst_18 = arith.constant dense<0.000000e+00> : vector<1x16xf32>
    %77 = tpu.matmul %75, %76, %cst_18 {dimension_numbers = #tpu.dot_dimension_numbers<[1], [0], [0], [1], [0, 0, 1, 1], [], []>} : vector<1x8xf32>, vector<8x16xf32>, vector<1x16xf32> -> vector<1x16xf32>
    %c0_19 = arith.constant 0 : index
    %c0_20 = arith.constant 0 : index
    %78 = vector.load %arg7[%c0_19, %c0_20] : memref<1x16xf32, #tpu.memory_space<vmem>>, vector<1x16xf32>
    %79 = arith.addf %77, %78 : vector<1x16xf32>
    %cst_21 = arith.constant 3.000000e+00 : f32
    %80 = vector.broadcast %cst_21 : f32 to vector<1x16xf32>
    %81 = arith.addf %79, %80 : vector<1x16xf32>
    %cst_22 = arith.constant 0.000000e+00 : f32
    %cst_23 = arith.constant 6.000000e+00 : f32
    %82 = vector.broadcast %cst_22 : f32 to vector<1x16xf32>
    %83 = arith.maximumf %82, %81 : vector<1x16xf32>
    %84 = vector.broadcast %cst_23 : f32 to vector<1x16xf32>
    %85 = arith.minimumf %84, %83 : vector<1x16xf32>
    %cst_24 = arith.constant 0.166666672 : f32
    %86 = vector.broadcast %cst_24 : f32 to vector<1x16xf32>
    %87 = arith.mulf %85, %86 : vector<1x16xf32>
    %88 = vector.shape_cast %87 : vector<1x16xf32> to vector<1x1x16xf32>
    %89 = vector.broadcast %88 : vector<1x1x16xf32> to vector<8x8x16xf32>
    %90 = arith.mulf %64, %89 : vector<8x8x16xf32>
    %91 = vector.shape_cast %90 : vector<8x8x16xf32> to vector<64x16xf32>
    %92 = arith.truncf %91 : vector<64x16xf32> to vector<64x16xbf16>
    %c0_25 = arith.constant 0 : index
    %c0_26 = arith.constant 0 : index
    %93 = vector.load %arg8[%c0_25, %c0_26] : memref<16x16xbf16, #tpu.memory_space<vmem>>, vector<16x16xbf16>
    %cst_27 = arith.constant dense<0.000000e+00> : vector<64x16xf32>
    %94 = tpu.matmul %92, %93, %cst_27 {dimension_numbers = #tpu.dot_dimension_numbers<[1], [0], [0], [1], [0, 0, 1, 1], [], []>} : vector<64x16xbf16>, vector<16x16xbf16>, vector<64x16xf32> -> vector<64x16xf32>
    %c0_28 = arith.constant 0 : index
    %c0_29 = arith.constant 0 : index
    %95 = vector.load %arg9[%c0_28, %c0_29] : memref<1x16xf32, #tpu.memory_space<vmem>>, vector<1x16xf32>
    %96 = vector.broadcast %95 : vector<1x16xf32> to vector<64x16xf32>
    %97 = arith.addf %94, %96 : vector<64x16xf32>
    %98 = vector.shape_cast %97 : vector<64x16xf32> to vector<8x8x16xf32>
    %99 = arith.truncf %98 : vector<8x8x16xf32> to vector<8x8x16xbf16>
    %c0_30 = arith.constant 0 : index
    %c0_31 = arith.constant 0 : index
    %c0_32 = arith.constant 0 : index
    %c0_33 = arith.constant 0 : index
    %100 = vector.load %arg10[%c0_30, %c0_31, %c0_32, %c0_33] : memref<1x8x8x16xbf16, #tpu.memory_space<vmem>>, vector<1x8x8x16xbf16>
    %101 = vector.shape_cast %100 : vector<1x8x8x16xbf16> to vector<8x8x16xbf16>
    %102 = vector.shape_cast %99 : vector<8x8x16xbf16> to vector<1x8x8x16xbf16>
    tpu.vector_store %arg10[%c0_30, %c0_31, %c0_32, %c0_33], %102 {strides = array<i32>} : memref<1x8x8x16xbf16, #tpu.memory_space<vmem>>, vector<1x8x8x16xbf16>,
    return
  }
  func.func @transform_0(%arg0: i32) -> (i32, i32, i32, i32) {
    %c0_i32 = arith.constant 0 : i32
    %c0_i32_0 = arith.constant 0 : i32
    %c0_i32_1 = arith.constant 0 : i32
    %c0_i32_2 = arith.constant 0 : i32
    return %arg0, %c0_i32, %c0_i32_0, %c0_i32_1 : i32, i32, i32, i32
  }
  func.func @transform_1(%arg0: i32) -> (i32, i32) {
    %c0_i32 = arith.constant 0 : i32
    %c0_i32_0 = arith.constant 0 : i32
    %c0_i32_1 = arith.constant 0 : i32
    return %c0_i32, %c0_i32_0 : i32, i32
  }
  func.func @transform_2(%arg0: i32) -> (i32, i32) {
    %c0_i32 = arith.constant 0 : i32
    %c0_i32_0 = arith.constant 0 : i32
    %c0_i32_1 = arith.constant 0 : i32
    return %c0_i32, %c0_i32_0 : i32, i32
  }
  func.func @transform_3(%arg0: i32) -> (i32, i32) {
    %c0_i32 = arith.constant 0 : i32
    %c0_i32_0 = arith.constant 0 : i32
    %c0_i32_1 = arith.constant 0 : i32
    return %c0_i32, %c0_i32_0 : i32, i32
  }
  func.func @transform_4(%arg0: i32) -> (i32, i32) {
    %c0_i32 = arith.constant 0 : i32
    %c0_i32_0 = arith.constant 0 : i32
    %c0_i32_1 = arith.constant 0 : i32
    return %c0_i32, %c0_i32_0 : i32, i32
  }
  func.func @transform_5(%arg0: i32) -> (i32, i32) {
    %c0_i32 = arith.constant 0 : i32
    %c0_i32_0 = arith.constant 0 : i32
    %c0_i32_1 = arith.constant 0 : i32
    return %c0_i32, %c0_i32_0 : i32, i32
  }
  func.func @transform_6(%arg0: i32) -> (i32, i32) {
    %c0_i32 = arith.constant 0 : i32
    %c0_i32_0 = arith.constant 0 : i32
    %c0_i32_1 = arith.constant 0 : i32
    return %c0_i32, %c0_i32_0 : i32, i32
  }
  func.func @transform_7(%arg0: i32) -> (i32, i32) {
    %c0_i32 = arith.constant 0 : i32
    %c0_i32_0 = arith.constant 0 : i32
    %c0_i32_1 = arith.constant 0 : i32
    return %c0_i32, %c0_i32_0 : i32, i32
  }
  func.func @transform_8(%arg0: i32) -> (i32, i32) {
    %c0_i32 = arith.constant 0 : i32
    %c0_i32_0 = arith.constant 0 : i32
    %c0_i32_1 = arith.constant 0 : i32
    return %c0_i32, %c0_i32_0 : i32, i32
  }
  func.func @transform_9(%arg0: i32) -> (i32, i32, i32, i32) {
    %c0_i32 = arith.constant 0 : i32
    %c0_i32_0 = arith.constant 0 : i32
    %c0_i32_1 = arith.constant 0 : i32
    %c0_i32_2 = arith.constant 0 : i32
    return %arg0, %c0_i32, %c0_i32_0, %c0_i32_1 : i32, i32, i32, i32
  }
}

</mosaic_0001>

<bundles_post_ra>
// kernel: tpu_custom_call.1
= control target key start
LH: loop header
LB: loop body
LE: loop exit
PB: predicated region body
PF: predicated region fallthrough
CT: control target
= control target key end

     0   :  { %14 = vsyncpa [#allocation3], 0  ;;  %s2090_s0 = inlined_call_operand.vmem [shape: bf16[2,36,16,16], index: 0, kind: input, shape index: {}]   ;;  %s2091_s1 = inlined_call_operand.vmem [shape: f32[9,16], index: 1, kind: input, shape index: {}]   ;;  %s2092_s2 = inlined_call_operand.vmem [shape: f32[1,16], index: 2, kind: input, shape index: {}]   ;;  %s2093_s3 = inlined_call_operand.vmem [shape: f32[16,8], index: 3, kind: input, shape index: {}]   ;;  %s2094_s4 = inlined_call_operand.vmem [shape: f32[1,8], index: 4, kind: input, shape index: {}]   ;;  %s2095_s5 = inlined_call_operand.vmem [shape: f32[8,16], index: 5, kind: input, shape index: {}]   ;;  %s2096_s6 = inlined_call_operand.vmem [shape: f32[1,16], index: 6, kind: input, shape index: {}]   ;;  %s2097_s7 = inlined_call_operand.vmem [shape: bf16[16,16], index: 7, kind: input, shape index: {}]   ;;  %s2098_s8 = inlined_call_operand.vmem [shape: f32[1,16], index: 8, kind: input, shape index: {}]   ;;  %s2099_s9 = inlined_call_operand.hbm [shape: bf16[2,8,8,16], index: 9, kind: output, shape index: {}]  }
   0x1   :  { %16 = vsyncpa [#allocation3 + $0x1], 0  ;;  %s1491_s30 = smov 0   ;;  %s1493_s10 = smov 0  }
   0x2   :  { %s1495_s11 = smov 0   ;;  %s1497_s12 = smov 0  }
   0x3 LB: > { %s1512_s13 = sadd.s32 4294967295, %s1433_s12   ;;  %s1182_s14 = sadd.s32 4294967294, %s1433_s12   ;;  %s1433_s12 = sphi %s1497_s12, %s2207_s12   ;;  %s1429_s11 = sphi %s1495_s11, %s2206_s11   ;;  %s1425_s10 = sphi %s1493_s10, %s2205_s10   ;;  %s1421_s30 = sphi %s1491_s30, %s2204_s30  }
   0x4   : > { %s1516_s15 = sadd.s32 1, %s1433_s12   ;;  %s223_s16 = sadd.s32 1, %s1429_s11 }
   0x5   : > { %s220_s17 = ssub.s32 %s1433_s12, %s1516_s15  ;;  %p233_p0 = scmp.ne.s32.totalorder %s1429_s11, %s1425_s10 }
   0x6   : > { %p221_p1 = scmp.eq.s32.totalorder %s220_s17, 0  ;;  %p234_p2 = scmp.eq.s32.totalorder %s1512_s13, 1 }
   0x7   : > { %p239_p3 = scmp.ne.s32.totalorder %s1425_s10, %s1421_s30  ;;  %p240_p4 = scmp.eq.s32.totalorder %s1182_s14, 1 }
   0x8   : > { %s1527_s18 = scalar_select %p221_p1, %s1429_s11, %s223_s16  }
   0x9   : > { %p1529_p5 = por %p234_p2, %p233_p0  ;;  %p1533_p6 = por %p240_p4, %p239_p3 }
   0xa   : > { %p1185_p7 = scmp.ge.s32.totalorder %s1433_s12, 1  ;;  %p290_p8 = scmp.lt.s32.totalorder %s1433_s12, 3 }
   0xc   : > { %p291_p9 = pnand %p1185_p7, %p290_p8 }
   0xe   : > { %294 = sbr.rel (%p291_p9) target bundleno = 821 (0x335), region = 56 }
  0x15   : > { %v824_v0 = vld [vmem:[%s2093_s3] sm:$0xff]  ;;  %v825_v1 = vld [vmem:[%s2093_s3 + $0x8] sm:$0xff]  ;;  %p326_p10 = scmp.lt.s32.totalorder %s1512_s13, 1  ;;  %v436_v2 = vlaneseq  ;;  %v1435_v3 = vmov 0.0|0.0   ;;  %vm1436_vm0 = vmmov 0   ;;  %v1437_v5 = vmov 0.0  }
  0x16   : > { %1320 = vmatprep.subr.bf16.mxu0 %v1435_v3  ;;  %v1321_v4 = vpack.c.bf16 %v825_v1, %v824_v0  ;;  %1302 = vmatprep.mubr.msk.f32.mxu0 %vm1436_vm0, %v1437_v5  ;;  %v434_v7 = vld [vmem:[%s2091_s1] sm:$0xff]  ;;  %vm584_vm1 = vcmask 1046528   ;;  %vm800_vm2 = vcmask 130048   ;;  %vm903_vm3 = vcmask 64512   ;;  %s323_s17 = sand.u32 1, %s1425_s10   ;;  %s1203_s24 = sshll.u32 %s1512_s13, 9 }
  0x17   : > { %s327_s25 = scalar_select %p326_p10, %s1512_s13, 1  ;;  %v1547_v6 = vshrl.u32 %v436_v2, 7  ;;  %1305 = vmatprep.subr.mxu1 %v1437_v5  ;;  %1307 = vmatprep.mubr.msk.f32.mxu1 %vm1436_vm0, %v1437_v5  ;;  %vm1097_vm4 = vcmask 125952  }
  0x18   : > { %1322 = vmatpush3.bf16.msra.mxu0 %v1321_v4  ;;  %s1186_s21 = sshll.u32 %s323_s17, 5  ;;  %s2049_s29 = scalar_lea.sflag [#allocation3], %s323_s17 }
  0x19   : > { %2127 = vst [vmem:[#allocation5_spill] sm:$0xff] %v1547_v6  ;;  %s1325_s28 = smul.u32 288, %s327_s25  ;;  %v2100_v8 = vsub.s32 0, %v1547_v6  ;;  %v450_v9 = vsub.s32 1, %v1547_v6  ;;  %v470_v10 = vsub.s32 3, %v1547_v6  ;;  %v490_v11 = vsub.s32 4, %v1547_v6 }
  0x1a   : > { %v510_v12 = vsub.s32 6, %v1547_v6  ;;  %v530_v13 = vsub.s32 7, %v1547_v6  ;;  %v550_v14 = vsub.s32 2, %v1547_v6  ;;  %v627_v15 = vsub.s32 5, %v1547_v6  ;;  %s325_s25 = scalar_lea.vmem [#allocation2], %s1186_s21 }
  0x1b   : > { %s1563_s16 = scalar_lea.vmem %s2090_s0, %s1325_s28  ;;  %v1567_v16 = vrot.slane %v434_v7, %v2100_v8  ;;  %v1569_v17 = vrot.slane %v434_v7, %v450_v9  ;;  %v1571_v18 = vrot.slane %v434_v7, %v470_v10  ;;  %v1573_v19 = vrot.slane %v434_v7, %v490_v11  ;;  %s1120_s26 = sshll.u32 %s325_s25, 4  ;;  %s2039_s26 = int_to_ptr.vmem [resolvable:$true] %s1120_s26 }
  0x1c   : > { %v1576_v20 = vld [vmem:[%s1563_s16] sm:$0xff]   ;;  %v1579_v21 = vld [vmem:[%s1563_s16 + $0x8] sm:$0xff]   ;;  %v1582_v22 = vld [vmem:[%s1563_s16 + $0x10] sm:$0xff]   ;;  %v1584_v23 = vrot.slane %v434_v7, %v510_v12  ;;  %v1586_v24 = vrot.slane %v434_v7, %v530_v13  ;;  %v1588_v25 = vrot.slane %v434_v7, %v550_v14  ;;  %v1590_v26 = vrot.slane %v434_v7, %v627_v15  ;;  %s2037_s28 = scalar_lea.hbm %s2099_s9, %s1203_s24  ;;  %s1371_s14 = scalar_lea.vmem %s2039_s26, 512 }
  0x1d   : > { %2128 = vst [vmem:[#allocation6_spill] sm:$0xff] %v1576_v20  ;;  %2129 = vst [vmem:[#allocation7_spill] sm:$0xff] %v1579_v21  ;;  %v2101_v27 = vunpack.c.l.bf16 %v1576_v20  ;;  %v1595_v29 = vunpack.c.l.bf16 %v1579_v21  ;;  %v1599_v31 = vld [vmem:[%s1563_s16 + $0x18] sm:$0xff]   ;;  %v1602_v32 = vld [vmem:[%s1563_s16 + $0x20] sm:$0xff]   ;;  %v1608_v34 = vunpack.c.l.bf16 %v1582_v22  ;;  %p1372_p11 = scmp.ne.s32.totalorder %s2039_s26, %s1371_s14 }
  0x1e   : > { %2130 = vst [vmem:[#allocation8_spill] sm:$0xff] %v1582_v22  ;;  %2131 = vst [vmem:[#allocation9_spill] sm:$0xff] %v1588_v25  ;;  %v1605_v33 = vld [vmem:[%s1563_s16 + $0x28] sm:$0xff]   ;;  %v1612_v36 = vunpack.c.l.bf16 %v1599_v31  ;;  %v1616_v38 = vld [vmem:[%s1563_s16 + $0x30] sm:$0xff]   ;;  %v1625_v41 = vunpack.c.l.bf16 %v1602_v32 }
  0x1f   : > { %2132 = vst [vmem:[#allocation10_spill] sm:$0xff] %v1590_v26  ;;  %2133 = vst [vmem:[#allocation11_spill] sm:$0xff] %v1599_v31  ;;  %v1619_v39 = vld [vmem:[%s1563_s16 + $0x38] sm:$0xff]   ;;  %v1622_v40 = vld [vmem:[%s1563_s16 + $0x40] sm:$0xff]   ;;  %v1629_v43 = vunpack.c.l.bf16 %v1605_v33  ;;  %v1633_v45 = vunpack.c.l.bf16 %v1616_v38  ;;  %v440_v37 = vmul.f32 %v2101_v27, %v1567_v16  ;;  %v441_v3 = vmul.f32 %v1595_v29, %v1567_v16  ;;  %p1373_p12 = pnand %p1372_p11, %p1529_p5 }
  0x20   : > { %2134 = vst [vmem:[#allocation12_spill] sm:$0xff] %v1602_v32  ;;  %2135 = vst [vmem:[#allocation13_spill] sm:$0xff] %v1605_v33  ;;  %v1637_v47 = vunpack.c.l.bf16 %v1619_v39  ;;  %v1641_v49 = vld [vmem:[%s1563_s16 + $0x48] ss:$8 sps:$4 sm:$0xff]   ;;  %v1651_v55 = vld [vmem:[%s1563_s16 + $0x98] sm:$0xff]   ;;  %v443_v60 = vmul.f32 %v1612_v36, %v1567_v16 }
  0x21   : > { %2136 = vst [vmem:[#allocation14_spill] sm:$0xff] %v1616_v38  ;;  %2137 = vst [vmem:[#allocation15_spill] sm:$0xff] %v1619_v39  ;;  %v1644_v50 = vld [vmem:[%s1563_s16 + $0x90] sm:$0xff]   ;;  %v1654_v56 = vld [vmem:[%s1563_s16 + $0xa0] sm:$0xff]   ;;  %v401_v61 = vunpack.c.l.bf16 %v1641_v49  ;;  %v2103_v59 = vunpack.c.h.bf16 %v1641_v49  ;;  %v2142_v20 = vunpack.c.l.bf16 %v1651_v55  ;;  %p1374_p13 = pneg %p1373_p12 }
  0x22   : > { %v1657_v57 = vld [vmem:[%s1563_s16 + $0xa8] sm:$0xff]   ;;  %v1664_v62 = vld [vmem:[%s1563_s16 + $0xb0] sm:$0xff]   ;;  %v1667_v63 = vld [vmem:[%s1563_s16 + $0xb8] sm:$0xff]   ;;  %v447_v27 = vmul.f32 %v1637_v47, %v1567_v16  ;;  %v2141_v21 = vunpack.c.l.bf16 %v1644_v50  ;;  %v2143_v25 = vunpack.c.l.bf16 %v1654_v56 }
  0x23   : > { %v1670_v0 = vld [vmem:[%s1563_s16 + $0xc0] sm:$0xff]   ;;  %v1676_v2 = vld [vmem:[%s1563_s16 + $0x68] ss:$8 sps:$4 sm:$0xff]   ;;  %v452_v58 = vmul.f32 %v1569_v17, %v401_v61  ;;  %v453_v53 = vmul.f32 %v1569_v17, %v2103_v59 }
  0x24   : > { %v1673_v1 = vld [vmem:[%s1563_s16 + $0x58] ss:$8 sps:$4 sm:$0xff]   ;;  %v1683_v9 = vld [vmem:[%s1563_s16 + $0xc8] sm:$0xff]   ;;  %v1709_v48 = vld [vmem:[%s1563_s16 + $0x110] sm:$0xf]  ;;  %v2119_v46 = vunpack.c.l.bf16 %v1676_v2 }
  0x25   : > { %v1686_v10 = vld [vmem:[%s1563_s16 + $0x78] ss:$8 sps:$4 sm:$0xff]   ;;  %v2105_v13 = vunpack.c.l.bf16 %v1673_v1  ;;  %v2112_v15 = vunpack.c.h.bf16 %v1673_v1  ;;  %v433_v5 = vunpack.c.l.bf16 %v1709_v48  ;;  %v446_v48 = vmul.f32 %v1633_v45, %v1567_v16 }
  0x26   : > { %v1689_v11 = vld [vmem:[%s1563_s16 + $0x88] ss:$80 sps:$4 sm:$0xff]   ;;  %v456_v52 = vmul.f32 %v1569_v17, %v2119_v46  ;;  %v2139_v6 = vunpack.c.l.bf16 %v1686_v10  ;;  %v2140_v26 = vunpack.c.h.bf16 %v1686_v10  ;;  %v460_v39 = vadd.f32 %v452_v58, %v440_v37 }
  0x27   : > { %v1698_v4 = vld [vmem:[%s1563_s16 + $0xe0] ss:$8 sps:$4 sm:$0xff]   ;;  %v1701_v7 = vld [vmem:[%s1563_s16 + $0xf0] ss:$8 sps:$4 sm:$0xff]   ;;  %v426_v35 = vunpack.c.h.bf16 %v1689_v11  ;;  %v454_v42 = vmul.f32 %v1569_v17, %v2105_v13  ;;  %v455_v44 = vmul.f32 %v1569_v17, %v2112_v15  ;;  %v461_v38 = vadd.f32 %v453_v53, %v441_v3 }
  0x28   : > { %v1706_v54 = vld [vmem:[%s1563_s16 + $0x100] ss:$8 sps:$4 sm:$0xff]   ;;  %v427_v30 = vunpack.c.l.bf16 %v1698_v4  ;;  %v428_v28 = vunpack.c.h.bf16 %v1698_v4  ;;  %v429_v51 = vunpack.c.l.bf16 %v1701_v7  ;;  %v430_v8 = vunpack.c.h.bf16 %v1701_v7  ;;  %s1438_s16 = smov [#allocation2]  }
  0x29   : > { %v431_v14 = vunpack.c.l.bf16 %v1706_v54  ;;  %v432_v12 = vunpack.c.h.bf16 %v1706_v54  ;;  %v442_v4 = vmul.f32 %v1608_v34, %v1567_v16  ;;  %v444_v7 = vmul.f32 %v1625_v41, %v1567_v16  ;;  %s1375_s21 = sshll.u32 %s1438_s16, 4  ;;  %s1376_s21 = int_to_ptr.vmem [resolvable:$false] %s1375_s21 }
  0x2a   : > { %v445_v54 = vmul.f32 %v1629_v43, %v1567_v16  ;;  %v2138_v16 = vunpack.c.h.bf16 %v1676_v2  ;;  %v458_v59 = vmul.f32 %v1569_v17, %v2139_v6  ;;  %v459_v13 = vmul.f32 %v1569_v17, %v2140_v26  ;;  %s1377_s22 = scalar_lea.vmem %s1376_s21, 1024  ;;  %p1378_p0 = scmp.lt.s32.totalorder %s2039_s26, %s1376_s21 }
  0x2b   : > { %v462_v33 = vadd.f32 %v454_v42, %v442_v4  ;;  %v463_v15 = vadd.f32 %v455_v44, %v443_v60  ;;  %v464_v32 = vadd.f32 %v456_v52, %v444_v7  ;;  %v473_v6 = vmul.f32 %v2142_v20, %v1571_v18  ;;  %p1379_p1 = scmp.lt.s32.totalorder %s1377_s22, %s1371_s14 }
  0x2c   : > { %v457_v61 = vmul.f32 %v1569_v17, %v2138_v16  ;;  %v466_v22 = vadd.f32 %v458_v59, %v446_v48  ;;  %v467_v46 = vadd.f32 %v459_v13, %v447_v27  ;;  %v472_v16 = vmul.f32 %v2141_v21, %v1571_v18 }
  0x2d   : > { %v474_v17 = vmul.f32 %v2143_v25, %v1571_v18  ;;  %v2144_v26 = vunpack.c.l.bf16 %v1657_v57  ;;  %v2145_v42 = vunpack.c.l.bf16 %v1664_v62  ;;  %v2146_v44 = vunpack.c.l.bf16 %v1667_v63  ;;  %p1380_p2 = por %p1379_p1, %p1378_p0 }
  0x2e   : > { %v465_v31 = vadd.f32 %v457_v61, %v445_v54  ;;  %v2147_v52 = vunpack.c.l.bf16 %v1670_v0  ;;  %v2148_v53 = vunpack.c.l.bf16 %v1683_v9  ;;  %v480_v58 = vadd.f32 %v472_v16, %v460_v39 }
  0x2f   : > { %v475_v37 = vmul.f32 %v2144_v26, %v1571_v18  ;;  %v476_v27 = vmul.f32 %v2145_v42, %v1571_v18  ;;  %v477_v21 = vmul.f32 %v2146_v44, %v1571_v18  ;;  %v481_v59 = vadd.f32 %v473_v6, %v461_v38  ;;  %p1381_p3 = pnand %p1380_p2, %p1374_p13 }
  0x30   : > { %v478_v20 = vmul.f32 %v2147_v52, %v1571_v18  ;;  %v479_v25 = vmul.f32 %v2148_v53, %v1571_v18  ;;  %v482_v60 = vadd.f32 %v474_v17, %v462_v33  ;;  %v492_v48 = vmul.f32 %v1573_v19, %v426_v35 }
  0x31   : > { %v483_v3 = vadd.f32 %v475_v37, %v463_v15  ;;  %v484_v13 = vadd.f32 %v476_v27, %v464_v32  ;;  %v485_v4 = vadd.f32 %v477_v21, %v465_v31  ;;  %v493_v61 = vmul.f32 %v1573_v19, %v427_v30 }
  0x32   : > { %v486_v7 = vadd.f32 %v478_v20, %v466_v22  ;;  %v487_v54 = vadd.f32 %v479_v25, %v467_v46  ;;  %v494_v26 = vmul.f32 %v1573_v19, %v428_v28  ;;  %v495_v42 = vmul.f32 %v1573_v19, %v429_v51 }
  0x33   : > { %v496_v44 = vmul.f32 %v1573_v19, %v430_v8  ;;  %v497_v18 = vmul.f32 %v1573_v19, %v431_v14  ;;  %v498_v38 = vmul.f32 %v1573_v19, %v432_v12  ;;  %v499_v33 = vmul.f32 %v1573_v19, %v433_v5 }
  0x34   : > { %v500_v32 = vadd.f32 %v492_v48, %v480_v58  ;;  %v501_v31 = vadd.f32 %v493_v61, %v481_v59  ;;  %v502_v22 = vadd.f32 %v494_v26, %v482_v60  ;;  %v503_v39 = vadd.f32 %v495_v42, %v483_v3 }
  0x35   : > { %v504_v46 = vadd.f32 %v496_v44, %v484_v13  ;;  %v505_v35 = vadd.f32 %v497_v18, %v485_v4  ;;  %v506_v15 = vadd.f32 %v498_v38, %v486_v7  ;;  %v507_v30 = vadd.f32 %v499_v33, %v487_v54 }
  0x36   : > { %v512_v28 = vmul.f32 %v1595_v29, %v1584_v23  ;;  %v513_v8 = vmul.f32 %v1608_v34, %v1584_v23  ;;  %v514_v51 = vmul.f32 %v1612_v36, %v1584_v23  ;;  %v515_v19 = vmul.f32 %v1625_v41, %v1584_v23 }
  0x37   : > { %v516_v5 = vmul.f32 %v1629_v43, %v1584_v23  ;;  %v517_v12 = vmul.f32 %v1633_v45, %v1584_v23  ;;  %v518_v14 = vmul.f32 %v1637_v47, %v1584_v23  ;;  %v2149_v16 = vunpack.c.l.bf16 %v1622_v40 }
  0x38   : > { %v520_v17 = vadd.f32 %v512_v28, %v500_v32  ;;  %v521_v37 = vadd.f32 %v513_v8, %v501_v31  ;;  %v522_v27 = vadd.f32 %v514_v51, %v502_v22  ;;  %v523_v21 = vadd.f32 %v515_v19, %v503_v39 }
  0x39   : > { %v519_v6 = vmul.f32 %v2149_v16, %v1584_v23  ;;  %v524_v52 = vadd.f32 %v516_v5, %v504_v46  ;;  %v525_v20 = vadd.f32 %v517_v12, %v505_v35  ;;  %v526_v53 = vadd.f32 %v518_v14, %v506_v15  ;;  %v2158_v46 = vld [vmem:[#allocation9_spill] sm:$0xff]  ;;  %v2159_v35 = vld [vmem:[#allocation6_spill] sm:$0xff]  ;;  %v2164_v5 = vld [vmem:[#allocation8_spill] sm:$0xff] }
  0x3a   : > { %v2150_v58 = vunpack.c.h.bf16 %v1641_v49  ;;  %v2151_v60 = vunpack.c.l.bf16 %v1673_v1  ;;  %v2152_v13 = vunpack.c.h.bf16 %v1673_v1  ;;  %v2153_v4 = vunpack.c.l.bf16 %v1676_v2 }
  0x3b   : > { %v527_v25 = vadd.f32 %v519_v6, %v507_v30  ;;  %v2154_v54 = vunpack.c.h.bf16 %v1676_v2  ;;  %v2155_v49 = vunpack.c.l.bf16 %v1686_v10  ;;  %v2156_v26 = vunpack.c.h.bf16 %v1686_v10  ;;  %v2166_v6 = vld [vmem:[#allocation11_spill] sm:$0xff] }
  0x3c   : > { %v532_v59 = vmul.f32 %v1586_v24, %v2150_v58  ;;  %v533_v3 = vmul.f32 %v1586_v24, %v2151_v60  ;;  %v534_v23 = vmul.f32 %v1586_v24, %v2152_v13  ;;  %v535_v7 = vmul.f32 %v1586_v24, %v2153_v4 }
  0x3d   : > { %v536_v48 = vmul.f32 %v1586_v24, %v2154_v54  ;;  %v537_v61 = vmul.f32 %v1586_v24, %v2155_v49  ;;  %v538_v42 = vmul.f32 %v1586_v24, %v2156_v26  ;;  %v2157_v1 = vunpack.c.l.bf16 %v1689_v11 }
  0x3e   : > { %v540_v18 = vadd.f32 %v532_v59, %v520_v17  ;;  %v541_v38 = vadd.f32 %v533_v3, %v521_v37  ;;  %v542_v33 = vadd.f32 %v534_v23, %v522_v27  ;;  %v543_v32 = vadd.f32 %v535_v7, %v523_v21  ;;  %v2168_v21 = vld [vmem:[#allocation12_spill] sm:$0xff]  ;;  %v2172_v3 = vld [vmem:[#allocation14_spill] sm:$0xff]  ;;  %v2174_v7 = vld [vmem:[#allocation15_spill] sm:$0xff] }
  0x3f   : > { %v539_v44 = vmul.f32 %v1586_v24, %v2157_v1  ;;  %v544_v31 = vadd.f32 %v536_v48, %v524_v52  ;;  %v545_v2 = vadd.f32 %v537_v61, %v525_v20  ;;  %v546_v22 = vadd.f32 %v538_v42, %v526_v53  ;;  %v2162_v24 = vld [vmem:[#allocation7_spill] sm:$0xff] }
  0x40   : > { %v2160_v15 = vunpack.c.l.bf16 %v2159_v35  ;;  %v2161_v10 = vunpack.c.h.bf16 %v2159_v35  ;;  %v554_v11 = vmul.f32 %v1595_v29, %v2158_v46  ;;  %v2163_v8 = vunpack.c.h.bf16 %v2162_v24 }
  0x41   : > { %v547_v39 = vadd.f32 %v539_v44, %v527_v25  ;;  %v556_v19 = vmul.f32 %v1608_v34, %v2158_v46  ;;  %v2165_v12 = vunpack.c.h.bf16 %v2164_v5  ;;  %v558_v16 = vmul.f32 %v1612_v36, %v2158_v46  ;;  %v2170_v25 = vld [vmem:[#allocation13_spill] sm:$0xff] }
  0x42   : > { %v552_v30 = vmul.f32 %v2160_v15, %v2158_v46  ;;  %v553_v28 = vmul.f32 %v2161_v10, %v2158_v46  ;;  %v555_v51 = vmul.f32 %v2163_v8, %v2158_v46  ;;  %v2167_v17 = vunpack.c.h.bf16 %v2166_v6 }
  0x43   : > { %v557_v14 = vmul.f32 %v2165_v12, %v2158_v46  ;;  %v560_v27 = vmul.f32 %v1625_v41, %v2158_v46  ;;  %v2169_v52 = vunpack.c.h.bf16 %v2168_v21  ;;  %v562_v53 = vmul.f32 %v1629_v43, %v2158_v46 }
  0x44   : > { %v559_v37 = vmul.f32 %v2167_v17, %v2158_v46  ;;  %v2171_v58 = vunpack.c.h.bf16 %v2170_v25  ;;  %v564_v60 = vmul.f32 %v1633_v45, %v2158_v46  ;;  %v2173_v13 = vunpack.c.h.bf16 %v2172_v3 }
  0x45   : > { %v561_v20 = vmul.f32 %v2169_v52, %v2158_v46  ;;  %v566_v4 = vmul.f32 %v1637_v47, %v2158_v46  ;;  %v2175_v54 = vunpack.c.h.bf16 %v2174_v7  ;;  %v585_v49 = vrot.slane %v552_v30, 1 }
  0x46   : > { %v563_v59 = vmul.f32 %v2171_v58, %v2158_v46  ;;  %v565_v23 = vmul.f32 %v2173_v13, %v2158_v46  ;;  %v586_v61 = vrot.slane %v553_v28, 1  ;;  %v588_v26 = vrot.slane %v554_v11, 1 }
  0x47   : > { %v567_v48 = vmul.f32 %v2175_v54, %v2158_v46  ;;  %v589_v42 = vrot.slane %v555_v51, 1  ;;  %v591_v1 = vrot.slane %v556_v19, 1  ;;  %v592_v44 = vrot.slane %v557_v14, 1 }
  0x48   : > { %v594_v35 = vrot.slane %v558_v16, 1  ;;  %v595_v15 = vrot.slane %v559_v37, 1  ;;  %v597_v10 = vrot.slane %v560_v27, 1  ;;  %v587_v8 = vsel %vm584_vm1, %v585_v49, %v586_v61 }
  0x49   : > { %v590_v12 = vsel %vm584_vm1, %v588_v26, %v589_v42  ;;  %v598_v17 = vrot.slane %v561_v20, 1  ;;  %v600_v52 = vrot.slane %v562_v53, 1  ;;  %v593_v58 = vsel %vm584_vm1, %v591_v1, %v592_v44 }
  0x4a   : > { %v596_v13 = vsel %vm584_vm1, %v594_v35, %v595_v15  ;;  %v601_v46 = vrot.slane %v563_v59, 1  ;;  %v603_v30 = vrot.slane %v564_v60, 1  ;;  %v604_v11 = vrot.slane %v565_v23, 1  ;;  %v2176_v60 = vld [vmem:[#allocation10_spill] sm:$0xff] }
  0x4b   : > { %v599_v28 = vsel %vm584_vm1, %v597_v10, %v598_v17  ;;  %v606_v51 = vrot.slane %v566_v4, 1  ;;  %v607_v19 = vrot.slane %v567_v48, 1  ;;  %v617_v16 = vadd.f32 %v587_v8, %v540_v18 }
  0x4c   : > { %v602_v14 = vsel %vm584_vm1, %v600_v52, %v601_v46  ;;  %v618_v37 = vadd.f32 %v590_v12, %v541_v38  ;;  %v619_v27 = vadd.f32 %v593_v58, %v542_v33  ;;  %v605_v54 = vsel %vm584_vm1, %v603_v30, %v604_v11 }
  0x4d   : > { %v608_v20 = vsel %vm584_vm1, %v606_v51, %v607_v19  ;;  %v620_v53 = vadd.f32 %v596_v13, %v543_v32  ;;  %v621_v49 = vadd.f32 %v599_v28, %v544_v31  ;;  %v622_v61 = vadd.f32 %v602_v14, %v545_v2 }
  0x4e   : > { %v623_v26 = vadd.f32 %v605_v54, %v546_v22  ;;  %v624_v59 = vadd.f32 %v608_v20, %v547_v39  ;;  %v2177_v42 = vunpack.c.l.bf16 %v1644_v50  ;;  %v2178_v4 = vunpack.c.h.bf16 %v1644_v50 }
  0x4f   : > { %v2179_v18 = vunpack.c.l.bf16 %v1651_v55  ;;  %v2180_v33 = vunpack.c.h.bf16 %v1651_v55  ;;  %v2181_v31 = vunpack.c.l.bf16 %v1654_v56  ;;  %v2182_v22 = vunpack.c.h.bf16 %v1654_v56 }
  0x50   : > { %v629_v23 = vmul.f32 %v2177_v42, %v2176_v60  ;;  %v630_v48 = vmul.f32 %v2178_v4, %v2176_v60  ;;  %v2183_v50 = vunpack.c.l.bf16 %v1657_v57  ;;  %v2184_v44 = vunpack.c.h.bf16 %v1657_v57 }
  0x51   : > { %v631_v38 = vmul.f32 %v2179_v18, %v2176_v60  ;;  %v632_v32 = vmul.f32 %v2180_v33, %v2176_v60  ;;  %v633_v2 = vmul.f32 %v2181_v31, %v2176_v60  ;;  %v634_v39 = vmul.f32 %v2182_v22, %v2176_v60 }
  0x52   : > { %v635_v1 = vmul.f32 %v2183_v50, %v2176_v60  ;;  %v636_v35 = vmul.f32 %v2184_v44, %v2176_v60  ;;  %v2185_v55 = vunpack.c.l.bf16 %v1664_v62  ;;  %v2186_v10 = vunpack.c.h.bf16 %v1664_v62 }
  0x53   : > { %v2187_v56 = vunpack.c.l.bf16 %v1667_v63  ;;  %v2188_v17 = vunpack.c.h.bf16 %v1667_v63  ;;  %v2189_v57 = vunpack.c.l.bf16 %v1670_v0  ;;  %v2190_v13 = vunpack.c.h.bf16 %v1670_v0 }
  0x54   : > { %v637_v15 = vmul.f32 %v2185_v55, %v2176_v60  ;;  %v638_v8 = vmul.f32 %v2186_v10, %v2176_v60  ;;  %v2191_v62 = vunpack.c.l.bf16 %v1683_v9  ;;  %v2192_v28 = vunpack.c.h.bf16 %v1683_v9 }
  0x55   : > { %v639_v12 = vmul.f32 %v2187_v56, %v2176_v60  ;;  %v640_v52 = vmul.f32 %v2188_v17, %v2176_v60  ;;  %v641_v58 = vmul.f32 %v2189_v57, %v2176_v60  ;;  %v642_v46 = vmul.f32 %v2190_v13, %v2176_v60 }
  0x56   : > { %v643_v30 = vmul.f32 %v2191_v62, %v2176_v60  ;;  %v644_v11 = vmul.f32 %v2192_v28, %v2176_v60  ;;  %v661_v51 = vrot.slane %v629_v23, 1  ;;  %v662_v19 = vrot.slane %v630_v48, 1  ;;  %v1188_v48 = vld [vmem:[%s2091_s1 + $0x8] ss:$0 sm:$0xff] }
  0x57   : > { %v664_v63 = vrot.slane %v631_v38, 1  ;;  %v665_v14 = vrot.slane %v632_v32, 1  ;;  %v667_v54 = vrot.slane %v633_v2, 1  ;;  %v668_v20 = vrot.slane %v634_v39, 1 }
  0x58   : > { %v670_v42 = vrot.slane %v635_v1, 1  ;;  %v671_v4 = vrot.slane %v636_v35, 1  ;;  %v673_v18 = vrot.slane %v637_v15, 1  ;;  %v663_v0 = vsel %vm584_vm1, %v661_v51, %v662_v19 }
  0x59   : > { %v666_v33 = vsel %vm584_vm1, %v664_v63, %v665_v14  ;;  %v674_v31 = vrot.slane %v638_v8, 1  ;;  %v676_v22 = vrot.slane %v639_v12, 1  ;;  %v669_v50 = vsel %vm584_vm1, %v667_v54, %v668_v20 }
  0x5a   : > { %v672_v9 = vsel %vm584_vm1, %v670_v42, %v671_v4  ;;  %v677_v60 = vrot.slane %v640_v52, 1  ;;  %v679_v23 = vrot.slane %v641_v58, 1  ;;  %v680_v32 = vrot.slane %v642_v46, 1 }
  0x5b   : > { %v675_v38 = vsel %vm584_vm1, %v673_v18, %v674_v31  ;;  %v682_v2 = vrot.slane %v643_v30, 1  ;;  %v683_v39 = vrot.slane %v644_v11, 1  ;;  %v693_v44 = vadd.f32 %v663_v0, %v617_v16 }
  0x5c   : > { %v678_v1 = vsel %vm584_vm1, %v676_v22, %v677_v60  ;;  %v694_v35 = vadd.f32 %v666_v33, %v618_v37  ;;  %v695_v55 = vadd.f32 %v669_v50, %v619_v27  ;;  %v681_v15 = vsel %vm584_vm1, %v679_v23, %v680_v32  ;;  %v1189_v60 = vld [vmem:[%s2092_s2] ss:$0 sm:$0xff] }
  0x5d   : > { %v684_v10 = vsel %vm584_vm1, %v682_v2, %v683_v39  ;;  %v696_v8 = vadd.f32 %v672_v9, %v620_v53  ;;  %v697_v56 = vadd.f32 %v675_v38, %v621_v49  ;;  %v698_v12 = vadd.f32 %v678_v1, %v622_v61 }
  0x5e   : > { %v699_v17 = vadd.f32 %v681_v15, %v623_v26  ;;  %v700_v52 = vadd.f32 %v684_v10, %v624_v59  ;;  %v705_v57 = vmul.f32 %v1595_v29, %v1188_v48  ;;  %v2193_v58 = vunpack.c.h.bf16 %v2162_v24 }
  0x5f   : > { %v707_v46 = vmul.f32 %v1608_v34, %v1188_v48  ;;  %v2194_v16 = vunpack.c.h.bf16 %v2164_v5  ;;  %v709_v27 = vmul.f32 %v1612_v36, %v1188_v48  ;;  %v2195_v62 = vunpack.c.h.bf16 %v2166_v6 }
  0x60   : > { %v706_v13 = vmul.f32 %v2193_v58, %v1188_v48  ;;  %v711_v53 = vmul.f32 %v1625_v41, %v1188_v48  ;;  %v2196_v49 = vunpack.c.h.bf16 %v2168_v21  ;;  %v713_v29 = vmul.f32 %v1629_v43, %v1188_v48 }
  0x61   : > { %v708_v37 = vmul.f32 %v2194_v16, %v1188_v48  ;;  %v710_v30 = vmul.f32 %v2195_v62, %v1188_v48  ;;  %v2197_v24 = vunpack.c.h.bf16 %v2170_v25  ;;  %v715_v34 = vmul.f32 %v1633_v45, %v1188_v48 }
  0x62   : > { %v712_v61 = vmul.f32 %v2196_v49, %v1188_v48  ;;  %v2198_v5 = vunpack.c.h.bf16 %v2172_v3  ;;  %v717_v36 = vmul.f32 %v1637_v47, %v1188_v48  ;;  %v2199_v6 = vunpack.c.h.bf16 %v2174_v7 }
  0x63   : > { %v714_v26 = vmul.f32 %v2197_v24, %v1188_v48  ;;  %v2200_v41 = vunpack.c.l.bf16 %v1622_v40  ;;  %v2201_v21 = vunpack.c.h.bf16 %v1622_v40  ;;  %v737_v43 = vrot.slane %v705_v57, 1 }
  0x64   : > { %v716_v59 = vmul.f32 %v2198_v5, %v1188_v48  ;;  %v718_v28 = vmul.f32 %v2199_v6, %v1188_v48  ;;  %v738_v19 = vrot.slane %v706_v13, 1  ;;  %v740_v25 = vrot.slane %v707_v46, 1 }
  0x65   : > { %v719_v11 = vmul.f32 %v2200_v41, %v1188_v48  ;;  %v720_v51 = vmul.f32 %v2201_v21, %v1188_v48  ;;  %v741_v63 = vrot.slane %v708_v37, 1  ;;  %v743_v14 = vrot.slane %v709_v27, 1 }
  0x66   : > { %v744_v45 = vrot.slane %v710_v30, 1  ;;  %v746_v54 = vrot.slane %v711_v53, 1  ;;  %v747_v3 = vrot.slane %v712_v61, 1  ;;  %v749_v20 = vrot.slane %v713_v29, 1 }
  0x67   : > { %v739_v47 = vsel %vm584_vm1, %v737_v43, %v738_v19  ;;  %v742_v7 = vsel %vm584_vm1, %v740_v25, %v741_v63  ;;  %v750_v42 = vrot.slane %v714_v26, 1  ;;  %v752_v4 = vrot.slane %v715_v34, 1 }
  0x68   : > { %v745_v18 = vsel %vm584_vm1, %v743_v14, %v744_v45  ;;  %v748_v40 = vsel %vm584_vm1, %v746_v54, %v747_v3  ;;  %v753_v0 = vrot.slane %v716_v59, 1  ;;  %v755_v33 = vrot.slane %v717_v36, 1 }
  0x69   : > { %v751_v31 = vsel %vm584_vm1, %v749_v20, %v750_v42  ;;  %v756_v22 = vrot.slane %v718_v28, 1  ;;  %v758_v50 = vrot.slane %v719_v11, 1  ;;  %v759_v9 = vrot.slane %v720_v51, 1  ;;  %v901_v20 = vld [vmem:[%s2095_s5] sm:$0xff] }
  0x6a   : > { %v754_v23 = vsel %vm584_vm1, %v752_v4, %v753_v0  ;;  %v769_v48 = vadd.f32 %v739_v47, %v693_v44  ;;  %v770_v38 = vadd.f32 %v742_v7, %v694_v35  ;;  %v771_v32 = vadd.f32 %v745_v18, %v695_v55  ;;  %1306 = vmatpush3.msra.mxu1 %v901_v20  ;;  %v826_v47 = vld [vmem:[%s2094_s4] sm:$0x1] }
  0x6b   : > { %v757_v2 = vsel %vm584_vm1, %v755_v33, %v756_v22  ;;  %v760_v39 = vsel %vm584_vm1, %v758_v50, %v759_v9  ;;  %v772_v1 = vadd.f32 %v748_v40, %v696_v8  ;;  %v773_v15 = vadd.f32 %v751_v31, %v697_v56  ;;  %v1370_v40 = vld [vmem:[%s2097_s7] sm:$0xff]  }
  0x6c   : > { %v774_v10 = vadd.f32 %v754_v23, %v698_v12  ;;  %v775_v57 = vadd.f32 %v757_v2, %v699_v17  ;;  %v1982_v58 = vadd.f32 %v1189_v60, %v769_v48  ;;  %v1984_v13 = vadd.f32 %v1189_v60, %v770_v38  ;;  %1310 = vmatprep.subr.bf16.mxu0 %v1370_v40  ;;  %v902_v0 = vld [vmem:[%s2096_s6] sm:$0x1] }
  0x6d   : > { %v1986_v46 = vadd.f32 %v1189_v60, %v771_v32  ;;  %v1988_v16 = vadd.f32 %v1189_v60, %v772_v1  ;;  %v1990_v44 = vadd.f32 %v1189_v60, %v773_v15  ;;  %v776_v35 = vadd.f32 %v760_v39, %v700_v52  ;;  %1323 = vmatprep.subr.bf16.mxu1 %v1370_v40  ;;  %v2202_v48 = vld [vmem:[#allocation5_spill] sm:$0xff] }
  0x6e   : > { %v792_v55 = vmax.f32 %v1982_v58, 0.0  ;;  %v789_v37 = vadd.f32 %v1189_v60, %v774_v10  ;;  %v793_v8 = vmax.f32 %v1984_v13, 0.0  ;;  %v790_v27 = vadd.f32 %v1189_v60, %v775_v57 }
  0x6f   : > { %v794_v56 = vmax.f32 %v1986_v46, 0.0  ;;  %v795_v12 = vmax.f32 %v1988_v16, 0.0  ;;  %v796_v62 = vmax.f32 %v1990_v44, 0.0  ;;  %v791_v52 = vadd.f32 %v1189_v60, %v776_v35 }
  0x70   : > { %v801_v17 = vsel %vm800_vm2, %v792_v55, 0.0  ;;  %v802_v30 = vsel %vm800_vm2, %v793_v8, 0.0  ;;  %v797_v61 = vmax.f32 %v789_v37, 0.0  ;;  %v798_v26 = vmax.f32 %v790_v27, 0.0 }
  0x71   : > { %v804_v53 = vsel %vm800_vm2, %v794_v56, 0.0  ;;  %v803_v49 = vadd.f32 %v802_v30, %v801_v17  ;;  %v806_v29 = vsel %vm800_vm2, %v795_v12, 0.0  ;;  %v808_v34 = vsel %vm800_vm2, %v796_v62, 0.0 }
  0x72   : > { %v799_v59 = vmax.f32 %v791_v52, 0.0  ;;  %v810_v36 = vsel %vm800_vm2, %v797_v61, 0.0  ;;  %v812_v28 = vsel %vm800_vm2, %v798_v26, 0.0  ;;  %v2203_v38 = vsub.s32 0, %v2202_v48 }
  0x73   : > { %v805_v24 = vadd.f32 %v804_v53, %v803_v49 }
  0x74   : > { %v814_v11 = vsel %vm800_vm2, %v799_v59, 0.0 }
  0x75   : > { %v807_v5 = vadd.f32 %v806_v29, %v805_v24 }
  0x77   : > { %v809_v6 = vadd.f32 %v808_v34, %v807_v5 }
  0x79   : > { %v811_v41 = vadd.f32 %v810_v36, %v809_v6 }
  0x7b   : > { %v813_v21 = vadd.f32 %v812_v28, %v811_v41 }
  0x7d   : > { %v815_v51 = vadd.f32 %v814_v11, %v813_v21 }
  0x7f   : > { %v816_v43 = vsel %vm800_vm2, %v815_v51, 0.0 }
  0x80   : > { %v817_v19 = vrot.slane %v816_v43, 4 }
  0x82   : > { %v818_v25 = vadd.f32 %v817_v19, %v816_v43 }
  0x84   : > { %v819_v63 = vrot.slane %v818_v25, 2 }
  0x86   : > { %v820_v14 = vadd.f32 %v819_v63, %v818_v25 }
  0x88   : > { %v821_v45 = vrot.slane %v820_v14, 1 }
  0x8a   : > { %v822_v54 = vadd.f32 %v821_v45, %v820_v14 }
  0x8c   : > { %v823_v3 = vmul.f32 0.015625, %v822_v54 }
  0x8e   : > { %1303 = vmatmul.mubr.msk.f32.vlgmr.msra.gmra.mrb[0].mxu0 %vm800_vm2, %v823_v3 }
  0x8f   : > { %1311 = vmatpush3.bf16.msra.mxu0 %v1370_v40 }
 0x161   : > { %v896_v7 = vpop.f32.mrb[0].mxu0 }
 0x162   : > { %v897_v42 = vadd.f32 %v896_v7, %v826_v47  ;;  %v1304_v4 = vpop.f32.mrb[1].mxu0 }
 0x164   : > { %v900_v18 = vmax.f32 %v897_v42, 0.0 }
 0x166   : > { %1308 = vmatmul.mubr.msk.f32.vlgmr.msra.gmra.mrb[0].mxu1 %vm903_vm3, %v900_v18 }
 0x167   : > { %1324 = vmatpush3.bf16.msra.mxu1 %v1370_v40 }
 0x239   : > { %v973_v33 = vpop.f32.mrb[0].mxu1 }
 0x23a   : > { %v974_v31 = vadd.f32 %v973_v33, %v902_v0  ;;  %v1309_v22 = vpop.f32.mrb[1].mxu1 }
 0x23c   : > { %v977_v50 = vadd.f32 3.0, %v974_v31 }
 0x23e   : > { %v978_v9 = vmax.f32 %v977_v50, 0.0 }
 0x240   : > { %v979_v60 = vmin.f32 %v978_v9, 6.0 }
 0x242   : > { %v980_v23 = vmul.f32 0.16666667, %v979_v60 }
 0x244   : > { %v984_v32 = vrot.slane %v980_v23, %v2203_v38 }
 0x246   : > { %v985_v2 = vmul.f32 %v984_v32, %v792_v55  ;;  %v986_v39 = vmul.f32 %v984_v32, %v793_v8  ;;  %v989_v1 = vmul.f32 %v984_v32, %v796_v62  ;;  %v990_v15 = vmul.f32 %v984_v32, %v797_v61  ;;  %v1192_v55 = vld [vmem:[%s2098_s8] ss:$0 sm:$0xff] }
 0x247   : > { %v987_v10 = vmul.f32 %v984_v32, %v794_v56  ;;  %v988_v57 = vmul.f32 %v984_v32, %v795_v12  ;;  %v991_v58 = vmul.f32 %v984_v32, %v798_v26  ;;  %v992_v13 = vmul.f32 %v984_v32, %v799_v59 }
 0x248   : > { %v993_v46 = vpack.c.bf16 %v986_v39, %v985_v2  ;;  %v995_v16 = vpack.c.bf16 %v990_v15, %v989_v1 }
 0x249   : > { %v994_v44 = vpack.c.bf16 %v988_v57, %v987_v10  ;;  %v996_v35 = vpack.c.bf16 %v992_v13, %v991_v58 }
 0x24a   : > { %1312 = vmatprep.mubr.msk.bf16.mxu0 %vm800_vm2, %v993_v46  ;;  %1316 = vmatprep.mubr.msk.bf16.mxu1 %vm800_vm2, %v995_v16 }
 0x24b   : > { %1313 = vmatmul.mubr.msk.bf16.vlgmr.msra.gmra.mrb[4].mxu0 %vm800_vm2, %v994_v44  ;;  %1317 = vmatmul.mubr.msk.bf16.vlgmr.msra.gmra.mrb[4].mxu1 %vm800_vm2, %v996_v35 }
 0x31e   : > { %v1314_v37 = vpop.f32.mrb[4].mxu0  ;;  %v1318_v8 = vpop.f32.mrb[4].mxu1 }
 0x31f   : > { %v1067_v56 = vadd.f32 %v1314_v37, %v1192_v55  ;;  %v1083_v12 = vadd.f32 %v1318_v8, %v1192_v55  ;;  %v1058_v17 = vpop.f32.mrb[5].mxu0  ;;  %v1074_v27 = vpop.f32.mrb[5].mxu1 }
 0x320   : > { %v1059_v62 = vadd.f32 %v1192_v55, %v1058_v17  ;;  %v1075_v30 = vadd.f32 %v1192_v55, %v1074_v27  ;;  %v1315_v53 = vpop.f32.mrb[6].mxu0  ;;  %v1319_v49 = vpop.f32.mrb[6].mxu1 }
 0x321   : > { %v1091_v52 = vpack.c.bf16 %v1067_v56, %v1067_v56  ;;  %v1095_v61 = vpack.c.bf16 %v1083_v12, %v1083_v12  ;;  %v1070_v29 = vadd.f32 %v1315_v53, %v1192_v55  ;;  %v1086_v24 = vadd.f32 %v1319_v49, %v1192_v55  ;;  %v1061_v26 = vpop.f32.mrb[7].mxu0  ;;  %v1077_v34 = vpop.f32.mrb[7].mxu1 }
 0x322   : > { %v1089_v5 = vpack.c.bf16 %v1059_v62, %v1059_v62  ;;  %v1093_v59 = vpack.c.bf16 %v1075_v30, %v1075_v30  ;;  %v1062_v36 = vadd.f32 %v1192_v55, %v1061_v26  ;;  %v1078_v6 = vadd.f32 %v1192_v55, %v1077_v34 }
 0x323   : > { %1100 = vst.msk [vmem:[%s325_s25 + $0x8] sm:$0xf] %vm1097_vm4, %v1091_v52  ;;  %1104 = vst.msk [vmem:[%s325_s25 + $0x18] sm:$0xf] %vm1097_vm4, %v1095_v61  ;;  %v1092_v28 = vpack.c.bf16 %v1070_v29, %v1070_v29  ;;  %v1096_v41 = vpack.c.bf16 %v1086_v24, %v1086_v24 }
 0x324   : > { %1098 = vst.msk [vmem:[%s325_s25] sm:$0xf] %vm1097_vm4, %v1089_v5  ;;  %1102 = vst.msk [vmem:[%s325_s25 + $0x10] sm:$0xf] %vm1097_vm4, %v1093_v59  ;;  %v1090_v11 = vpack.c.bf16 %v1062_v36, %v1062_v36  ;;  %v1094_v21 = vpack.c.bf16 %v1078_v6, %v1078_v6 }
 0x325   : > { %1101 = vst.msk [vmem:[%s325_s25 + $0xc] sm:$0xf] %vm1097_vm4, %v1092_v28  ;;  %1105 = vst.msk [vmem:[%s325_s25 + $0x1c] sm:$0xf] %vm1097_vm4, %v1096_v41 }
 0x326   : > { %1099 = vst.msk [vmem:[%s325_s25 + $0x4] sm:$0xf] %vm1097_vm4, %v1090_v11  ;;  %1103 = vst.msk [vmem:[%s325_s25 + $0x14] sm:$0xf] %vm1097_vm4, %v1094_v21 }
 0x327   : > { %1384 = shalt.err (!%p1381_p3)
}
 0x328   : > { %s1385_s17 = scalar_lea.hbm %s2037_s28, 512  ;;  %s1389_s25 = scalar_lea.hbm %s2099_s9, 1024 }
 0x329   : > { %p1386_p4 = scmp.ne.s32.totalorder %s2037_s28, %s1385_s17  ;;  %p1390_p9 = scmp.lt.u32.totalorder %s2037_s28, %s2099_s9 }
 0x32a   : > { %p1391_p10 = scmp.lt.u32.totalorder %s1389_s25, %s1385_s17  ;;  %p1393_p12 = scmp.lt.u32.totalorder %s1385_s17, %s2037_s28 }
 0x32b   : > { %p1387_p7 = pnand %p1386_p4, %p1529_p5 }
 0x32c   : > { %p1392_p11 = por %p1391_p10, %p1390_p9 }
 0x32d   : > { %p1388_p8 = pneg %p1387_p7 }
 0x32e   : > { %p1394_p13 = por %p1393_p12, %p1392_p11 }
 0x330   : > { %p1395_p0 = pnand %p1394_p13, %p1388_p8 }
 0x332   : > { %1398 = shalt.err (!%p1395_p0)
}
 0x333   : > { %s1439_s14 = smov 64   ;;  %s1440_s16 = smov 4  }
 0x334   : > { %1326 = dma.vmem_to_hbm [thread:$0]  (%p1529_p5), %s2039_s26, 512, %s2037_s28, %s2049_s29, %s1439_s14, %s1439_s14, %s1440_s16  }
 0x335 PF: > { %p1332_p1 = scmp.ge.s32.totalorder %s1433_s12, 2  ;;  %s1135_s21 = sand.u32 1, %s1421_s30  }
 0x336   : > { %s1136_s22 = scalar_lea.sflag [#allocation3], %s1135_s21 }
 0x337   : > { %p1329_p2 = pnand %p1332_p1, %p1533_p6 }
 0x339   : > { %1416 = dma.done.wait (!%p1329_p2), %s1136_s22, 512  }
 0x33a   : > { %1418 = vsyncadd (!%p1329_p2), %s1136_s22, 4294966784  ;;  %p19_p3 = scmp.ge.s32.totalorder %s1516_s15, 4   ;;  %s2204_s30 = smov %s1425_s10 }
 0x33b   : > { %s2205_s10 = smov %s1429_s11  ;;  %s2206_s11 = smov %s1527_s18 }
 0x33c   : > { %s2207_s12 = smov %s1516_s15  ;;  %21 = sbr.rel (!%p19_p3) target bundleno = 3 (0x3), region = 91 }
 0x343   :  { %1141 = vsyncpa [#allocation3], 1 }
 0x344   :  { %1143 = vsyncpa [#allocation3 + $0x1], 1 }

</bundles_post_ra>
